<compile_context>
chip_gen: v5e
topology: v5e:2x2
jax: 0.10.0
libtpu: 0.0.40
codegen_flags: <defaults>
</compile_context>

<pallas_src>
import functools

import jax
import jax.numpy as jnp
from jax.experimental import pallas as pl
from jax.experimental.pallas import tpu as pltpu


def _fast_sigmoid(s):
    # sigmoid(s) == 0.5 * (tanh(s / 2) + 1); single EUP transcendental.
    # (v5e note: if the bf16-output DMA ever stops hiding this f32 tanh, swap in a
    #  VPU polynomial approximation — EUP has no bf16 path on v5e.)
    return 0.5 * (jnp.tanh(0.5 * s) + 1.0)


def _vmem_capacity_bytes():
    try:
        info = pltpu.get_tpu_info()
        cap = getattr(info, "vmem_capacity_bytes", None)
        if cap:
            return int(cap)
    except Exception:
        pass
    return 64 << 20  # conservative default (v7x per-TC VMEM)


def _pick_tile(n, target, mult, min_blocks=1):
    """Largest multiple-of-`mult` divisor of n that is <= target.

    Prefers choices giving at least `min_blocks` grid blocks (megacore on v7x);
    falls back to a single full-extent block if n has no suitable divisor.
    """
    target = max(mult, min(target, n))
    cands = [d for d in range(mult, target + 1, mult) if n % d == 0]
    pref = [d for d in cands if n // d >= min_blocks]
    if pref:
        return max(pref)
    if cands:
        return max(cands)
    return n


# ----------------------------- dropout (training) -----------------------------


def _dropout_prng_kernel(seed_ref, x_ref, o_ref, *, threshold, inv_keep):
    # Distinct, deterministic seed per grid step.
    pltpu.prng_seed(seed_ref[0] + pl.program_id(0) * jnp.int32(1000003))
    bits = pltpu.prng_random_bits(x_ref.shape)
    if bits.dtype != jnp.uint32:
        bits = pltpu.bitcast(bits, jnp.uint32)
    keep = bits < jnp.uint32(threshold)
    kept = x_ref[...].astype(jnp.float32) * jnp.float32(inv_keep)
    o_ref[...] = jnp.where(keep, kept, 0.0).astype(o_ref.dtype)


def _apply_dropout_pallas(x, keep_prob, seed_arr, out_dtype):
    """Inverted dropout with an on-chip PRNG mask, on a lane-dense 2D view."""
    N, D = x.shape
    total = N * D

    # Lane-dense view: prefer a last dim that is a multiple of 128.
    if D % 128 == 0:
        rows, cols = N, D
        view = x
    else:
        cols = next((c for c in (2048, 1024, 512, 256, 128) if total % c == 0), None)
        if cols is None:
            rows, cols = N, D           # fall back to masked partial stores
            view = x
        else:
            rows = total // cols        # row-major reshape: free layout plumbing
            view = x.reshape(rows, cols)

    tr = _pick_tile(rows, 512, 8)
    threshold = min(int(keep_prob * float(1 << 32)), (1 << 32) - 1)
    inv_keep = 1.0 / keep_prob

    out = pl.pallas_call(
        functools.partial(_dropout_prng_kernel, threshold=threshold, inv_keep=inv_keep),
        out_shape=jax.ShapeDtypeStruct((rows, cols), out_dtype),
        grid_spec=pltpu.PrefetchScalarGridSpec(
            num_scalar_prefetch=1,
            grid=(rows // tr,),
            in_specs=[pl.BlockSpec((tr, cols), lambda i, seed: (i, 0))],
            out_specs=pl.BlockSpec((tr, cols), lambda i, seed: (i, 0)),
        ),
        compiler_params=pltpu.CompilerParams(dimension_semantics=("arbitrary",)),
    )(seed_arr, view)
    return out.reshape(N, D)


# ------------------------------ act(Z @ Z^T) -----------------------------------


def _decoder_kernel(xi_ref, xj_ref, o_ref, *, activation, tn, rhs_resident):
    a = xi_ref[...]                                      # (tm, D)
    if rhs_resident:
        # Whole Z is resident in VMEM; slice the j-th row tile out of it.
        j = pl.multiple_of(pl.program_id(1) * tn, tn)
        b = xj_ref[pl.ds(j, tn), :]                      # (tn, D)
    else:
        b = xj_ref[...]                                  # (tn, D)
    # Contract last dim of both operands: Z_i @ Z_j^T with NO transpose.
    s = jax.lax.dot_general(
        a, b,
        dimension_numbers=(((1,), (1,)), ((), ())),
        preferred_element_type=jnp.float32,
    )
    o_ref[...] = activation(s).astype(o_ref.dtype)


def inner_product_decoder(
    x,
    *,
    droprate: float = 0.0,
    activation=None,
    training: bool = True,
    rng=None,
    compute_dtype=jnp.bfloat16,   # MXU operand dtype; accumulation is always f32
    out_dtype=None,               # default bf16: halves the N*N HBM writeback
    tm: int = 512,
    tn: int = 2048,
):
    """Pallas implementation of InnerProductDecoder.forward: act(drop(Z) @ drop(Z)^T)."""
    N, D = x.shape
    if activation is None:
        activation = _fast_sigmoid
    if out_dtype is None:
        out_dtype = jnp.bfloat16

    # ---- dropout (training only) ----
    if training and droprate > 0.0:
        keep_prob = 1.0 - float(droprate)
        if keep_prob <= 0.0:
            xd = jnp.zeros((N, D), compute_dtype)
        else:
            if rng is None:
                rng = jax.random.PRNGKey(0)
            if jax.devices()[0].platform == "tpu":
                seed_arr = jax.random.randint(
                    rng, (1,), minval=0, maxval=jnp.iinfo(jnp.int32).max,
                    dtype=jnp.int32)
                xd = _apply_dropout_pallas(x, keep_prob, seed_arr, compute_dtype)
            else:
                # Fallback for interpret / non-TPU backends: host-side uniforms.
                keep = jax.random.uniform(rng, x.shape, dtype=jnp.float32) < keep_prob
                xd = jnp.where(keep, x.astype(jnp.float32) / keep_prob, 0.0)
                xd = xd.astype(compute_dtype)
    else:
        xd = x.astype(compute_dtype)

    # ---- tiling / VMEM budgeting ----
    vmem_cap = _vmem_capacity_bytes()
    in_bytes = jnp.dtype(compute_dtype).itemsize
    out_bytes = jnp.dtype(out_dtype).itemsize

    tm = _pick_tile(N, tm, 8, min_blocks=2)   # >=2 row blocks keeps both v7x TCs busy
    tn = _pick_tile(N, tn, 128)               # lane-dense, unmasked output stores

    # Generation-aware resident-RHS cutoff: generous on 128 MiB chips (v5e/v6e),
    # tighter on 64 MiB (v7x).
    resident_cutoff = (24 << 20) if vmem_cap >= (96 << 20) else (10 << 20)
    rhs_resident = (N * D * in_bytes) <= resident_cutoff

    rhs_elems = (N if rhs_resident else tn) * D
    needed = (
        2 * tm * D * in_bytes            # double-buffered LHS tiles
        + 2 * rhs_elems * in_bytes       # RHS (worst case: double buffered)
        + 2 * tm * tn * out_bytes        # double-buffered output tiles
        + tm * tn * 4                    # f32 dot_general intermediate
    )
    vmem_limit = max(int(1.5 * needed) + (4 << 20), 32 << 20)
    vmem_limit = max(min(vmem_limit, int(0.75 * vmem_cap)), 16 << 20)

    def build(single_buffer_rhs):
        if rhs_resident:
            kwargs = {}
            if single_buffer_rhs:
                # Constant block index -> second buffer is pure VMEM waste.
                kwargs["pipeline_mode"] = pl.Buffered(1)
            rhs_spec = pl.BlockSpec((N, D), lambda i, j: (0, 0), **kwargs)
        else:
            rhs_spec = pl.BlockSpec((tn, D), lambda i, j: (j, 0))
        return pl.pallas_call(
            functools.partial(
                _decoder_kernel, activation=activation, tn=tn,
                rhs_resident=rhs_resident),
            out_shape=jax.ShapeDtypeStruct((N, N), out_dtype),
            grid=(N // tm, N // tn),
            in_specs=[
                pl.BlockSpec((tm, D), lambda i, j: (i, 0)),  # LHS row tile of Z
                rhs_spec,                                    # RHS: resident Z or (tn, D)
            ],
            out_specs=pl.BlockSpec((tm, tn), lambda i, j: (i, j)),
            compiler_params=pltpu.CompilerParams(
                dimension_semantics=("parallel", "parallel"),
                vmem_limit_bytes=vmem_limit,
            ),
        )

    if rhs_resident:
        try:
            return build(True)(xd, xd)
        except Exception:
            # Fall back to default double buffering if Buffered(1) is rejected.
            return build(False)(xd, xd)
    return build(False)(xd, xd)


if __name__ == "__main__":
    key = jax.random.PRNGKey(0)
    N, D = 256, 64
    z = jax.random.normal(key, (N, D), dtype=jnp.float32)

    # High-precision reference (explicit HIGHEST so XLA doesn't demote to bf16).
    logits_ref = jax.lax.dot_general(
        z, z, dimension_numbers=(((1,), (1,)), ((), ())),
        precision=jax.lax.Precision.HIGHEST,
    )
    ref = jax.nn.sigmoid(logits_ref)

    # 1) Eval mode, full f32 path: tight check against the reference.
    out_f32 = jax.block_until_ready(inner_product_decoder(
        z, droprate=0.5, training=False,
        compute_dtype=jnp.float32, out_dtype=jnp.float32))
    assert out_f32.shape == (N, N)
    assert jnp.allclose(out_f32, ref, atol=1e-3, rtol=1e-3), "f32 path mismatch"

    # 2) Eval mode, default fast path (bf16 MXU operands, f32 accum, bf16 output).
    out_fast = jax.block_until_ready(inner_product_decoder(
        z, droprate=0.5, training=False))
    assert out_fast.shape == (N, N)
    assert out_fast.dtype == jnp.bfloat16
    assert jnp.allclose(out_fast.astype(jnp.float32), ref, atol=6e-2), "bf16 path mismatch"

    # 3) Training mode: on-chip PRNG dropout, deterministic for a fixed rng.
    out_tr1 = jax.block_until_ready(inner_product_decoder(
        z, droprate=0.1, training=True, rng=jax.random.PRNGKey(42)))
    out_tr2 = jax.block_until_ready(inner_product_decoder(
        z, droprate=0.1, training=True, rng=jax.random.PRNGKey(42)))
    assert out_tr1.shape == (N, N)
    f = out_tr1.astype(jnp.float32)
    assert bool(jnp.all(jnp.isfinite(f)))
    assert bool(jnp.all((f >= 0.0) & (f <= 1.0)))
    assert bool(jnp.all(out_tr1 == out_tr2)), "dropout not deterministic for fixed rng"

    print("KERNEL_OK")
</pallas_src>

<mosaic_0001>
module attributes {stable_mosaic.version = 11 : i64} {
  func.func @_decoder_kernel(%arg0: i32, %arg1: i32, %arg2: memref<128x64xf32, #tpu.memory_space<vmem>>, %arg3: memref<256x64xf32, #tpu.memory_space<vmem>>, %arg4: memref<128x256xf32, #tpu.memory_space<vmem>>) attributes {dimension_semantics = [#tpu.dimension_semantics<parallel>, #tpu.dimension_semantics<parallel>], iteration_bounds = array<i64: 2, 1>, scalar_prefetch = 0 : i64, scratch_operands = 0 : i64, tpu.core_type = #tpu.core_type<tc>, window_params = [{transform_indices = @transform_0, window_bounds = array<i64: 128, 64>}, {pipeline_mode = #tpu.pipeline_mode<synchronous>, transform_indices = @transform_1, window_bounds = array<i64: 256, 64>}, {transform_indices = @transform_2, window_bounds = array<i64: 128, 256>}]} {
    %c0 = arith.constant 0 : index
    %c0_0 = arith.constant 0 : index
    %0 = vector.load %arg2[%c0, %c0_0] : memref<128x64xf32, #tpu.memory_space<vmem>>, vector<128x64xf32>
    %c256_i32 = arith.constant 256 : i32
    %1 = arith.muli %arg1, %c256_i32 : i32
    %2 = tpu.assume_multiple %1, 256 : i32
    %3 = arith.index_cast %2 : i32 to index
    %c0_1 = arith.constant 0 : index
    %4 = vector.load %arg3[%3, %c0_1] : memref<256x64xf32, #tpu.memory_space<vmem>>, vector<256x64xf32>
    %cst = arith.constant dense<0.000000e+00> : vector<128x256xf32>
    %5 = tpu.matmul %0, %4, %cst {dimension_numbers = #tpu.dot_dimension_numbers<[1], [1], [0], [0], [0, 0, 1, 0], [], []>} : vector<128x64xf32>, vector<256x64xf32>, vector<128x256xf32> -> vector<128x256xf32>
    %cst_2 = arith.constant 5.000000e-01 : f32
    %6 = vector.broadcast %cst_2 : f32 to vector<128x256xf32>
    %7 = arith.mulf %6, %5 : vector<128x256xf32>
    %8 = math.tanh %7 : vector<128x256xf32>
    %cst_3 = arith.constant 1.000000e+00 : f32
    %9 = vector.broadcast %cst_3 : f32 to vector<128x256xf32>
    %10 = arith.addf %8, %9 : vector<128x256xf32>
    %cst_4 = arith.constant 5.000000e-01 : f32
    %11 = vector.broadcast %cst_4 : f32 to vector<128x256xf32>
    %12 = arith.mulf %11, %10 : vector<128x256xf32>
    %c0_5 = arith.constant 0 : index
    %c0_6 = arith.constant 0 : index
    %13 = vector.load %arg4[%c0_5, %c0_6] : memref<128x256xf32, #tpu.memory_space<vmem>>, vector<128x256xf32>
    tpu.vector_store %arg4[%c0_5, %c0_6], %12 {strides = array<i32>} : memref<128x256xf32, #tpu.memory_space<vmem>>, vector<128x256xf32>,
    return
  }
  func.func @transform_0(%arg0: i32, %arg1: i32) -> (i32, i32) {
    %c0_i32 = arith.constant 0 : i32
    %c0_i32_0 = arith.constant 0 : i32
    return %arg0, %c0_i32 : i32, i32
  }
  func.func @transform_1(%arg0: i32, %arg1: i32) -> (i32, i32) {
    %c0_i32 = arith.constant 0 : i32
    %c0_i32_0 = arith.constant 0 : i32
    %c0_i32_1 = arith.constant 0 : i32
    return %c0_i32, %c0_i32_0 : i32, i32
  }
  func.func @transform_2(%arg0: i32, %arg1: i32) -> (i32, i32) {
    %c0_i32 = arith.constant 0 : i32
    return %arg0, %arg1 : i32, i32
  }
}

module attributes {stable_mosaic.version = 11 : i64} {
  func.func @_decoder_kernel(%arg0: i32, %arg1: i32, %arg2: memref<128x64xf32, #tpu.memory_space<vmem>>, %arg3: memref<256x64xf32, #tpu.memory_space<vmem>>, %arg4: memref<128x256xf32, #tpu.memory_space<vmem>>) attributes {dimension_semantics = [#tpu.dimension_semantics<parallel>, #tpu.dimension_semantics<parallel>], iteration_bounds = array<i64: 2, 1>, scalar_prefetch = 0 : i64, scratch_operands = 0 : i64, tpu.core_type = #tpu.core_type<tc>, window_params = [{transform_indices = @transform_0, window_bounds = array<i64: 128, 64>}, {pipeline_mode = #tpu.pipeline_mode<synchronous>, transform_indices = @transform_1, window_bounds = array<i64: 256, 64>}, {transform_indices = @transform_2, window_bounds = array<i64: 128, 256>}]} {
    %c0 = arith.constant 0 : index
    %c0_0 = arith.constant 0 : index
    %0 = vector.load %arg2[%c0, %c0_0] : memref<128x64xf32, #tpu.memory_space<vmem>>, vector<128x64xf32>
    %c256_i32 = arith.constant 256 : i32
    %1 = arith.muli %arg1, %c256_i32 : i32
    %2 = tpu.assume_multiple %1, 256 : i32
    %3 = arith.index_cast %2 : i32 to index
    %c0_1 = arith.constant 0 : index
    %4 = vector.load %arg3[%3, %c0_1] : memref<256x64xf32, #tpu.memory_space<vmem>>, vector<256x64xf32>
    %cst = arith.constant dense<0.000000e+00> : vector<128x256xf32>
    %5 = tpu.matmul %0, %4, %cst {dimension_numbers = #tpu.dot_dimension_numbers<[1], [1], [0], [0], [0, 0, 1, 0], [], []>} : vector<128x64xf32>, vector<256x64xf32>, vector<128x256xf32> -> vector<128x256xf32>
    %cst_2 = arith.constant 5.000000e-01 : f32
    %6 = vector.broadcast %cst_2 : f32 to vector<128x256xf32>
    %7 = arith.mulf %6, %5 : vector<128x256xf32>
    %8 = math.tanh %7 : vector<128x256xf32>
    %cst_3 = arith.constant 1.000000e+00 : f32
    %9 = vector.broadcast %cst_3 : f32 to vector<128x256xf32>
    %10 = arith.addf %8, %9 : vector<128x256xf32>
    %cst_4 = arith.constant 5.000000e-01 : f32
    %11 = vector.broadcast %cst_4 : f32 to vector<128x256xf32>
    %12 = arith.mulf %11, %10 : vector<128x256xf32>
    %c0_5 = arith.constant 0 : index
    %c0_6 = arith.constant 0 : index
    %13 = vector.load %arg4[%c0_5, %c0_6] : memref<128x256xf32, #tpu.memory_space<vmem>>, vector<128x256xf32>
    tpu.vector_store %arg4[%c0_5, %c0_6], %12 {strides = array<i32>} : memref<128x256xf32, #tpu.memory_space<vmem>>, vector<128x256xf32>,
    return
  }
  func.func @transform_0(%arg0: i32, %arg1: i32) -> (i32, i32) {
    %c0_i32 = arith.constant 0 : i32
    %c0_i32_0 = arith.constant 0 : i32
    return %arg0, %c0_i32 : i32, i32
  }
  func.func @transform_1(%arg0: i32, %arg1: i32) -> (i32, i32) {
    %c0_i32 = arith.constant 0 : i32
    %c0_i32_0 = arith.constant 0 : i32
    %c0_i32_1 = arith.constant 0 : i32
    return %c0_i32, %c0_i32_0 : i32, i32
  }
  func.func @transform_2(%arg0: i32, %arg1: i32) -> (i32, i32) {
    %c0_i32 = arith.constant 0 : i32
    return %arg0, %arg1 : i32, i32
  }
}

</mosaic_0001>

<bundles_post_ra>
// kernel: tpu_custom_call.1
= control target key start
LH: loop header
LB: loop body
LE: loop exit
PB: predicated region body
PF: predicated region fallthrough
CT: control target
= control target key end

     0   :  { %7 = vsyncpa [#allocation3], 0  ;;  %s1414_s0 = inlined_call_operand.vmem [shape: f32[256,64], index: 0, kind: input, shape index: {}]   ;;  %s1415_s1 = inlined_call_operand.vmem [shape: f32[256,64], index: 1, kind: input, shape index: {}]   ;;  %s1416_s2 = inlined_call_operand.hbm [shape: f32[256,256], index: 2, kind: output, shape index: {}]  }
   0x1   :  { %9 = vsyncpa [#allocation3 + $0x1], 0  ;;  %s1069_s9 = smov 0   ;;  %s1071_s10 = smov 0  }
   0x2   :  { %s1073_s11 = smov 0   ;;  %s1075_s12 = smov 0  }
   0x3   :  { %s1077_s13 = smov 0   ;;  %s1079_s14 = smov 0  }
   0x4 LB: > { %s739_s15 = sadd.s32 4294967295, %s1050_s14   ;;  %s740_s16 = sadd.s32 4294967294, %s1050_s14   ;;  %s1050_s14 = sphi %s1079_s14, %s15_s14   ;;  %s1046_s13 = sphi %s1077_s13, %s1423_s13   ;;  %s1042_s12 = sphi %s1075_s12, %s1422_s12   ;;  %s1038_s11 = sphi %s1073_s11, %s1421_s11   ;;  %s1034_s10 = sphi %s1071_s10, %s1420_s10   ;;  %s1030_s9 = sphi %s1069_s9, %s1419_s9  }
   0x5   : > { %s27_s17 = sadd.s32 1, %s1046_s13  ;;  %s83_s18 = sadd.s32 1, %s1038_s11 }
   0x6   : > { %p29_p0 = scmp.ge.s32.totalorder %s27_s17, 2  ;;  %p93_p1 = scmp.ne.s32.totalorder %s1038_s11, %s1034_s10 }
   0x7   : > { %p94_p2 = scmp.eq.s32.totalorder %s739_s15, 1  ;;  %p99_p3 = scmp.ne.s32.totalorder %s1034_s10, %s1030_s9 }
   0x8   : > { %s1425_s17 = smov (%p29_p0, %s27_s17), 0  ;;  %p100_p5 = scmp.eq.s32.totalorder %s740_s16, 1 }
   0x9   : > { %p1109_p4 = por %p94_p2, %p93_p1  ;;  %s78_s20 = ssub.s32 %s1046_s13, %s1425_s17 }
   0xa   : > { %p743_p6 = scmp.ge.s32.totalorder %s1050_s14, 1  ;;  %p81_p7 = scmp.eq.s32.totalorder %s78_s20, 0 }
   0xb   : > { %p1116_p8 = por %p100_p5, %p99_p3  ;;  %p130_p9 = scmp.lt.s32.totalorder %s1050_s14, 3 }
   0xc   : > { %s1122_s22 = scalar_select %p81_p7, %s1038_s11, %s83_s18  }
   0xd   : > { %p131_p10 = pnand %p743_p6, %p130_p9 }
   0xe   : > { %s745_s7 = sshll.u32 (!%p131_p10), %s1042_s12, 4  ;;  %s149_s16 = sand.u32 (!%p131_p10), 1, %s1034_s10  }
   0xf   : > { %134 = sbr.rel (%p131_p10) target bundleno = 290 (0x122), region = 28  ;;  %p153_p11 = scmp.lt.s32.totalorder (!%p131_p10), %s745_s7, 31 }
  0x10   : > { %s744_s18 = sshll.u32 (!%p131_p10), %s149_s16, 8  ;;  %s818_s23 = sshll.u32 (!%p131_p10), %s1042_s12, 8 }
  0x11   : > { %s1341_s20 = scalar_lea.vmem (!%p131_p10), [#allocation2], %s744_s18  ;;  %s660_s26 = scalar_lea.hbm (!%p131_p10), %s1416_s2, %s818_s23 }
  0x12   : > { %s661_s12 = sshll.u32 (!%p131_p10), %s1341_s20, 4  ;;  %s663_s27 = sshll.u32 (!%p131_p10), %s660_s26, 4  ;;  %s662_s12 = int_to_ptr.vmem [resolvable:$true] %s661_s12  ;;  %s664_s27 = int_to_ptr.hbm [resolvable:$true] %s663_s27 }
  0x13   : > { %s646_s28 = scalar_lea.sflag (!%p131_p10), [#allocation3], %s149_s16  ;;  %s986_s29 = sshra.s32 (!%p131_p10), %s664_s27, 4  ;;  %s987_s29 = int_to_ptr.hbm [resolvable:$true] %s986_s29 }
  0x14   : > { %v193_v0 = vld [vmem:[%s1415_s1 + $0x78] sm:$0xff]  ;;  %vm210_vm0 = vcmask 523264   ;;  %v192_v2 = vld [vmem:[%s1415_s1 + $0x70] sm:$0xff]  ;;  %v191_v4 = vld [vmem:[%s1415_s1 + $0x68] sm:$0xff]  ;;  %s1427_s7 = smov (!%p153_p11, %s745_s7), 31  ;;  %s992_s5 = scalar_lea.hbm %s1416_s2, 512 }
  0x15   : > { %v209_v1 = vld [vmem:[%s1415_s1 + $0xf8] sm:$0xff]  ;;  %819 = vmatpush.xpose.msk.msra.mxu2 %vm210_vm0, %v193_v0  ;;  %v208_v3 = vld [vmem:[%s1415_s1 + $0xf0] sm:$0xff]  ;;  %747 = vmatpush.xpose.msk.msra.mxu0 %vm210_vm0, %v193_v0  ;;  %v207_v5 = vld [vmem:[%s1415_s1 + $0xe8] sm:$0xff]  ;;  %s746_s30 = sshll.u32 %s1427_s7, 3  ;;  %p993_p1 = scmp.lt.s32.totalorder %s987_s29, %s1416_s2 }
  0x16   : > { %835 = vmatpush.xpose.msk.msra.mxu3 %vm210_vm0, %v209_v1  ;;  %779 = vmatpush.xpose.msk.msra.mxu1 %vm210_vm0, %v209_v1  ;;  %v190_v6 = vld [vmem:[%s1415_s1 + $0x60] sm:$0xff]  ;;  %v189_v8 = vld [vmem:[%s1415_s1 + $0x58] sm:$0xff]  ;;  %v188_v10 = vld [vmem:[%s1415_s1 + $0x50] sm:$0xff]  ;;  %s1284_s7 = scalar_lea.vmem %s1414_s0, %s746_s30  ;;  %s988_s30 = scalar_lea.hbm %s987_s29, 256 }
  0x17   : > { %v206_v7 = vld [vmem:[%s1415_s1 + $0xe0] sm:$0xff]  ;;  %v205_v9 = vld [vmem:[%s1415_s1 + $0xd8] sm:$0xff]  ;;  %v204_v11 = vld [vmem:[%s1415_s1 + $0xd0] sm:$0xff]  ;;  %p989_p12 = scmp.ne.s32.totalorder %s987_s29, %s988_s30  ;;  %p994_p2 = scmp.lt.s32.totalorder %s992_s5, %s988_s30 }
  0x18   : > { %v187_v12 = vld [vmem:[%s1415_s1 + $0x48] sm:$0xff]  ;;  %v186_v14 = vld [vmem:[%s1415_s1 + $0x40] sm:$0xff]  ;;  %v185_v16 = vld [vmem:[%s1415_s1 + $0x38] sm:$0xff] }
  0x19   : > { %820 = vmatpush.xpose.msk.msra.mxu2 %vm210_vm0, %v192_v2  ;;  %748 = vmatpush.xpose.msk.msra.mxu0 %vm210_vm0, %v192_v2  ;;  %v203_v13 = vld [vmem:[%s1415_s1 + $0xc8] sm:$0xff]  ;;  %v202_v15 = vld [vmem:[%s1415_s1 + $0xc0] sm:$0xff]  ;;  %v201_v17 = vld [vmem:[%s1415_s1 + $0xb8] sm:$0xff]  ;;  %p990_p13 = pnand %p989_p12, %p1109_p4  ;;  %p995_p3 = por %p994_p2, %p993_p1 }
  0x1a   : > { %836 = vmatpush.xpose.msk.msra.mxu3 %vm210_vm0, %v208_v3  ;;  %780 = vmatpush.xpose.msk.msra.mxu1 %vm210_vm0, %v208_v3  ;;  %v184_v18 = vld [vmem:[%s1415_s1 + $0x30] sm:$0xff]  ;;  %v183_v20 = vld [vmem:[%s1415_s1 + $0x28] sm:$0xff]  ;;  %v182_v22 = vld [vmem:[%s1415_s1 + $0x20] sm:$0xff] }
  0x1b   : > { %v200_v19 = vld [vmem:[%s1415_s1 + $0xb0] sm:$0xff]  ;;  %v199_v21 = vld [vmem:[%s1415_s1 + $0xa8] sm:$0xff]  ;;  %v198_v23 = vld [vmem:[%s1415_s1 + $0xa0] sm:$0xff]  ;;  %p991_p0 = pneg %p990_p13 }
  0x1c   : > { %v181_v24 = vld [vmem:[%s1415_s1 + $0x18] sm:$0xff]  ;;  %v180_v26 = vld [vmem:[%s1415_s1 + $0x10] sm:$0xff]  ;;  %v179_v28 = vld [vmem:[%s1415_s1 + $0x8] sm:$0xff] }
  0x1d   : > { %821 = vmatpush.xpose.msk.msra.mxu2 %vm210_vm0, %v191_v4  ;;  %749 = vmatpush.xpose.msk.msra.mxu0 %vm210_vm0, %v191_v4  ;;  %v197_v25 = vld [vmem:[%s1415_s1 + $0x98] sm:$0xff]  ;;  %v196_v27 = vld [vmem:[%s1415_s1 + $0x90] sm:$0xff]  ;;  %v195_v29 = vld [vmem:[%s1415_s1 + $0x88] sm:$0xff]  ;;  %p996_p5 = pnand %p995_p3, %p991_p0 }
  0x1e   : > { %837 = vmatpush.xpose.msk.msra.mxu3 %vm210_vm0, %v207_v5  ;;  %781 = vmatpush.xpose.msk.msra.mxu1 %vm210_vm0, %v207_v5  ;;  %v178_v30 = vld [vmem:[%s1415_s1] sm:$0xff]  ;;  %v169_v34 = vld [vmem:[%s1284_s7 + $0x48] sm:$0xff]  ;;  %v170_v36 = vld [vmem:[%s1284_s7 + $0x50] sm:$0xff] }
  0x1f   : > { %v194_v31 = vld [vmem:[%s1415_s1 + $0x80] sm:$0xff]  ;;  %v161_v35 = vld [vmem:[%s1284_s7 + $0x8] sm:$0xff]  ;;  %v162_v37 = vld [vmem:[%s1284_s7 + $0x10] sm:$0xff] }
  0x20   : > { %v168_v32 = vld [vmem:[%s1284_s7 + $0x40] sm:$0xff]  ;;  %v171_v38 = vld [vmem:[%s1284_s7 + $0x58] sm:$0xff]  ;;  %v173_v42 = vld [vmem:[%s1284_s7 + $0x68] sm:$0xff] }
  0x21   : > { %822 = vmatpush.xpose.msk.msra.mxu2 %vm210_vm0, %v190_v6  ;;  %750 = vmatpush.xpose.msk.msra.mxu0 %vm210_vm0, %v190_v6  ;;  %v160_v33 = vld [vmem:[%s1284_s7] sm:$0xff]  ;;  %v163_v39 = vld [vmem:[%s1284_s7 + $0x18] sm:$0xff]  ;;  %v165_v43 = vld [vmem:[%s1284_s7 + $0x28] sm:$0xff] }
  0x22   : > { %838 = vmatpush.xpose.msk.msra.mxu3 %vm210_vm0, %v206_v7  ;;  %782 = vmatpush.xpose.msk.msra.mxu1 %vm210_vm0, %v206_v7  ;;  %v172_v40 = vld [vmem:[%s1284_s7 + $0x60] sm:$0xff]  ;;  %v174_v44 = vld [vmem:[%s1284_s7 + $0x70] sm:$0xff]  ;;  %v175_v46 = vld [vmem:[%s1284_s7 + $0x78] sm:$0xff] }
  0x23   : > { %v164_v41 = vld [vmem:[%s1284_s7 + $0x20] sm:$0xff]  ;;  %v166_v45 = vld [vmem:[%s1284_s7 + $0x30] sm:$0xff]  ;;  %v167_v47 = vld [vmem:[%s1284_s7 + $0x38] sm:$0xff] }
  0x25   : > { %823 = vmatpush.xpose.msk.msra.mxu2 %vm210_vm0, %v189_v8  ;;  %751 = vmatpush.xpose.msk.msra.mxu0 %vm210_vm0, %v189_v8 }
  0x26   : > { %839 = vmatpush.xpose.msk.msra.mxu3 %vm210_vm0, %v205_v9  ;;  %783 = vmatpush.xpose.msk.msra.mxu1 %vm210_vm0, %v205_v9 }
  0x29   : > { %824 = vmatpush.xpose.msk.msra.mxu2 %vm210_vm0, %v188_v10  ;;  %752 = vmatpush.xpose.msk.msra.mxu0 %vm210_vm0, %v188_v10 }
  0x2a   : > { %840 = vmatpush.xpose.msk.msra.mxu3 %vm210_vm0, %v204_v11  ;;  %784 = vmatpush.xpose.msk.msra.mxu1 %vm210_vm0, %v204_v11 }
  0x2d   : > { %825 = vmatpush.xpose.msk.msra.mxu2 %vm210_vm0, %v187_v12  ;;  %753 = vmatpush.xpose.msk.msra.mxu0 %vm210_vm0, %v187_v12 }
  0x2e   : > { %841 = vmatpush.xpose.msk.msra.mxu3 %vm210_vm0, %v203_v13  ;;  %785 = vmatpush.xpose.msk.msra.mxu1 %vm210_vm0, %v203_v13 }
  0x31   : > { %826 = vmatpush.xpose.msk.msra.mxu2 %vm210_vm0, %v186_v14  ;;  %754 = vmatpush.xpose.msk.msra.mxu0 %vm210_vm0, %v186_v14 }
  0x32   : > { %842 = vmatpush.xpose.msk.msra.mxu3 %vm210_vm0, %v202_v15  ;;  %786 = vmatpush.xpose.msk.msra.mxu1 %vm210_vm0, %v202_v15 }
  0x35   : > { %827 = vmatpush.xpose.msk.msra.mxu2 %vm210_vm0, %v185_v16  ;;  %755 = vmatpush.xpose.msk.msra.mxu0 %vm210_vm0, %v185_v16 }
  0x36   : > { %843 = vmatpush.xpose.msk.msra.mxu3 %vm210_vm0, %v201_v17  ;;  %787 = vmatpush.xpose.msk.msra.mxu1 %vm210_vm0, %v201_v17 }
  0x39   : > { %828 = vmatpush.xpose.msk.msra.mxu2 %vm210_vm0, %v184_v18  ;;  %756 = vmatpush.xpose.msk.msra.mxu0 %vm210_vm0, %v184_v18 }
  0x3a   : > { %844 = vmatpush.xpose.msk.msra.mxu3 %vm210_vm0, %v200_v19  ;;  %788 = vmatpush.xpose.msk.msra.mxu1 %vm210_vm0, %v200_v19 }
  0x3d   : > { %829 = vmatpush.xpose.msk.msra.mxu2 %vm210_vm0, %v183_v20  ;;  %757 = vmatpush.xpose.msk.msra.mxu0 %vm210_vm0, %v183_v20 }
  0x3e   : > { %845 = vmatpush.xpose.msk.msra.mxu3 %vm210_vm0, %v199_v21  ;;  %789 = vmatpush.xpose.msk.msra.mxu1 %vm210_vm0, %v199_v21 }
  0x41   : > { %830 = vmatpush.xpose.msk.msra.mxu2 %vm210_vm0, %v182_v22  ;;  %758 = vmatpush.xpose.msk.msra.mxu0 %vm210_vm0, %v182_v22 }
  0x42   : > { %846 = vmatpush.xpose.msk.msra.mxu3 %vm210_vm0, %v198_v23  ;;  %790 = vmatpush.xpose.msk.msra.mxu1 %vm210_vm0, %v198_v23 }
  0x45   : > { %831 = vmatpush.xpose.msk.msra.mxu2 %vm210_vm0, %v181_v24  ;;  %759 = vmatpush.xpose.msk.msra.mxu0 %vm210_vm0, %v181_v24 }
  0x46   : > { %847 = vmatpush.xpose.msk.msra.mxu3 %vm210_vm0, %v197_v25  ;;  %791 = vmatpush.xpose.msk.msra.mxu1 %vm210_vm0, %v197_v25 }
  0x49   : > { %832 = vmatpush.xpose.msk.msra.mxu2 %vm210_vm0, %v180_v26  ;;  %760 = vmatpush.xpose.msk.msra.mxu0 %vm210_vm0, %v180_v26 }
  0x4a   : > { %848 = vmatpush.xpose.msk.msra.mxu3 %vm210_vm0, %v196_v27  ;;  %792 = vmatpush.xpose.msk.msra.mxu1 %vm210_vm0, %v196_v27 }
  0x4d   : > { %833 = vmatpush.xpose.msk.msra.mxu2 %vm210_vm0, %v179_v28  ;;  %761 = vmatpush.xpose.msk.msra.mxu0 %vm210_vm0, %v179_v28 }
  0x4e   : > { %849 = vmatpush.xpose.msk.msra.mxu3 %vm210_vm0, %v195_v29  ;;  %793 = vmatpush.xpose.msk.msra.mxu1 %vm210_vm0, %v195_v29 }
  0x51   : > { %834 = vmatpush.xpose.msk.msra.mxu2 %vm210_vm0, %v178_v30  ;;  %762 = vmatpush.xpose.msk.msra.mxu0 %vm210_vm0, %v178_v30 }
  0x52   : > { %850 = vmatpush.xpose.msk.msra.mxu3 %vm210_vm0, %v194_v31  ;;  %794 = vmatpush.xpose.msk.msra.mxu1 %vm210_vm0, %v194_v31 }
  0x54   : > { %771 = vmatmul.msk.f32.vlgmr.msra.gmra.mxu2 %vm210_vm0, %v168_v32  ;;  %763 = vmatmul.msk.f32.vlgmr.msra.gmra.mxu0 %vm210_vm0, %v160_v33 }
  0x55   : > { %803 = vmatmul.msk.f32.vlgmr.msra.gmra.mxu3 %vm210_vm0, %v168_v32  ;;  %795 = vmatmul.msk.f32.vlgmr.msra.gmra.mxu1 %vm210_vm0, %v160_v33 }
  0x5c   : > { %772 = vmatmul.msk.f32.gmra.mxu2 %vm210_vm0, %v169_v34  ;;  %764 = vmatmul.msk.f32.gmra.mxu0 %vm210_vm0, %v161_v35 }
  0x5d   : > { %804 = vmatmul.msk.f32.gmra.mxu3 %vm210_vm0, %v169_v34  ;;  %796 = vmatmul.msk.f32.gmra.mxu1 %vm210_vm0, %v161_v35 }
  0x64   : > { %773 = vmatmul.msk.f32.gmra.mxu2 %vm210_vm0, %v170_v36  ;;  %765 = vmatmul.msk.f32.gmra.mxu0 %vm210_vm0, %v162_v37 }
  0x65   : > { %805 = vmatmul.msk.f32.gmra.mxu3 %vm210_vm0, %v170_v36  ;;  %797 = vmatmul.msk.f32.gmra.mxu1 %vm210_vm0, %v162_v37 }
  0x6c   : > { %774 = vmatmul.msk.f32.gmra.mxu2 %vm210_vm0, %v171_v38  ;;  %766 = vmatmul.msk.f32.gmra.mxu0 %vm210_vm0, %v163_v39 }
  0x6d   : > { %806 = vmatmul.msk.f32.gmra.mxu3 %vm210_vm0, %v171_v38  ;;  %798 = vmatmul.msk.f32.gmra.mxu1 %vm210_vm0, %v163_v39 }
  0x74   : > { %775 = vmatmul.msk.f32.gmra.mxu2 %vm210_vm0, %v172_v40  ;;  %767 = vmatmul.msk.f32.gmra.mxu0 %vm210_vm0, %v164_v41 }
  0x75   : > { %807 = vmatmul.msk.f32.gmra.mxu3 %vm210_vm0, %v172_v40  ;;  %799 = vmatmul.msk.f32.gmra.mxu1 %vm210_vm0, %v164_v41 }
  0x7c   : > { %776 = vmatmul.msk.f32.gmra.mxu2 %vm210_vm0, %v173_v42  ;;  %768 = vmatmul.msk.f32.gmra.mxu0 %vm210_vm0, %v165_v43 }
  0x7d   : > { %808 = vmatmul.msk.f32.gmra.mxu3 %vm210_vm0, %v173_v42  ;;  %800 = vmatmul.msk.f32.gmra.mxu1 %vm210_vm0, %v165_v43 }
  0x84   : > { %777 = vmatmul.msk.f32.gmra.mxu2 %vm210_vm0, %v174_v44  ;;  %769 = vmatmul.msk.f32.gmra.mxu0 %vm210_vm0, %v166_v45 }
  0x85   : > { %809 = vmatmul.msk.f32.gmra.mxu3 %vm210_vm0, %v174_v44  ;;  %801 = vmatmul.msk.f32.gmra.mxu1 %vm210_vm0, %v166_v45 }
  0x8c   : > { %778 = vmatmul.msk.f32.gmra.mxu2 %vm210_vm0, %v175_v46  ;;  %770 = vmatmul.msk.f32.gmra.mxu0 %vm210_vm0, %v167_v47 }
  0x8d   : > { %810 = vmatmul.msk.f32.gmra.mxu3 %vm210_vm0, %v175_v46  ;;  %802 = vmatmul.msk.f32.gmra.mxu1 %vm210_vm0, %v167_v47 }
  0xd1   : > { %v372_v48 = vpop.f32.mrf.mxu0 }
  0xd2   : > { %v437_v49 = vpop.f32.mrf.mxu1  ;;  %v485_v50 = vmul.f32 0.5, %v372_v48 }
  0xd3   : > { %v486_v51 = vmul.f32 0.5, %v437_v49 }
  0xd4   : > { %908 = vtanh.f32 %v485_v50 }
  0xd5   : > { %910 = vtanh.f32 %v486_v51 }
  0xd7   : > { %v396_v52 = vpop.f32.mrf.mxu2 }
  0xd8   : > { %v461_v53 = vpop.f32.mrf.mxu3  ;;  %v501_v54 = vmul.f32 0.5, %v396_v52 }
  0xd9   : > { %v502_v55 = vmul.f32 0.5, %v461_v53  ;;  %v375_v56 = vpop.f32.mrf.mxu0 }
  0xda   : > { %912 = vtanh.f32 %v501_v54  ;;  %v440_v57 = vpop.f32.mrf.mxu1  ;;  %v909_v58 = vpop.eup %908  ;;  %v487_v59 = vmul.f32 0.5, %v375_v56 }
  0xdb   : > { %914 = vtanh.f32 %v502_v55  ;;  %v488_v60 = vmul.f32 0.5, %v440_v57  ;;  %v911_v61 = vpop.eup %910  ;;  %v549_v62 = vadd.f32 1.0, %v909_v58 }
  0xdc   : > { %v550_v63 = vadd.f32 1.0, %v911_v61  ;;  %916 = vtanh.f32 %v487_v59 }
  0xdd   : > { %v581_v0 = vmul.f32 0.5, %v549_v62  ;;  %918 = vtanh.f32 %v488_v60 }
  0xde   : > { %v582_v1 = vmul.f32 0.5, %v550_v63 }
  0xdf   : > { %v399_v2 = vpop.f32.mrf.mxu2  ;;  %613 = vst [vmem:[%s1341_s20] sm:$0xff] %v581_v0 }
  0xe0   : > { %v464_v3 = vpop.f32.mrf.mxu3  ;;  %v913_v4 = vpop.eup %912  ;;  %v503_v5 = vmul.f32 0.5, %v399_v2  ;;  %614 = vst [vmem:[%s1341_s20 + $0x8] sm:$0xff] %v582_v1 }
  0xe1   : > { %v504_v6 = vmul.f32 0.5, %v464_v3  ;;  %v915_v7 = vpop.eup %914  ;;  %v565_v8 = vadd.f32 1.0, %v913_v4  ;;  %v378_v10 = vpop.f32.mrf.mxu0 }
  0xe2   : > { %v566_v9 = vadd.f32 1.0, %v915_v7  ;;  %920 = vtanh.f32 %v503_v5  ;;  %v443_v11 = vpop.f32.mrf.mxu1  ;;  %v917_v12 = vpop.eup %916  ;;  %v489_v14 = vmul.f32 0.5, %v378_v10 }
  0xe3   : > { %v597_v13 = vmul.f32 0.5, %v565_v8  ;;  %922 = vtanh.f32 %v504_v6  ;;  %v490_v15 = vmul.f32 0.5, %v443_v11  ;;  %v919_v16 = vpop.eup %918  ;;  %v551_v18 = vadd.f32 1.0, %v917_v12 }
  0xe4   : > { %v598_v17 = vmul.f32 0.5, %v566_v9  ;;  %v552_v19 = vadd.f32 1.0, %v919_v16  ;;  %924 = vtanh.f32 %v489_v14 }
  0xe5   : > { %629 = vst [vmem:[%s1341_s20 + $0x80] sm:$0xff] %v597_v13  ;;  %v583_v20 = vmul.f32 0.5, %v551_v18  ;;  %926 = vtanh.f32 %v490_v15 }
  0xe6   : > { %630 = vst [vmem:[%s1341_s20 + $0x88] sm:$0xff] %v598_v17  ;;  %v584_v21 = vmul.f32 0.5, %v552_v19 }
  0xe7   : > { %v402_v22 = vpop.f32.mrf.mxu2  ;;  %615 = vst [vmem:[%s1341_s20 + $0x10] sm:$0xff] %v583_v20 }
  0xe8   : > { %v467_v23 = vpop.f32.mrf.mxu3  ;;  %v921_v24 = vpop.eup %920  ;;  %v505_v25 = vmul.f32 0.5, %v402_v22  ;;  %616 = vst [vmem:[%s1341_s20 + $0x18] sm:$0xff] %v584_v21 }
  0xe9   : > { %v506_v26 = vmul.f32 0.5, %v467_v23  ;;  %v923_v27 = vpop.eup %922  ;;  %v567_v28 = vadd.f32 1.0, %v921_v24  ;;  %v381_v30 = vpop.f32.mrf.mxu0 }
  0xea   : > { %v568_v29 = vadd.f32 1.0, %v923_v27  ;;  %928 = vtanh.f32 %v505_v25  ;;  %v446_v31 = vpop.f32.mrf.mxu1  ;;  %v925_v32 = vpop.eup %924  ;;  %v491_v34 = vmul.f32 0.5, %v381_v30 }
  0xeb   : > { %v599_v33 = vmul.f32 0.5, %v567_v28  ;;  %930 = vtanh.f32 %v506_v26  ;;  %v492_v35 = vmul.f32 0.5, %v446_v31  ;;  %v927_v36 = vpop.eup %926  ;;  %v553_v38 = vadd.f32 1.0, %v925_v32 }
  0xec   : > { %v600_v37 = vmul.f32 0.5, %v568_v29  ;;  %v554_v39 = vadd.f32 1.0, %v927_v36  ;;  %932 = vtanh.f32 %v491_v34 }
  0xed   : > { %631 = vst [vmem:[%s1341_s20 + $0x90] sm:$0xff] %v599_v33  ;;  %v585_v40 = vmul.f32 0.5, %v553_v38  ;;  %934 = vtanh.f32 %v492_v35 }
  0xee   : > { %632 = vst [vmem:[%s1341_s20 + $0x98] sm:$0xff] %v600_v37  ;;  %v586_v41 = vmul.f32 0.5, %v554_v39 }
  0xef   : > { %v405_v42 = vpop.f32.mrf.mxu2  ;;  %617 = vst [vmem:[%s1341_s20 + $0x20] sm:$0xff] %v585_v40 }
  0xf0   : > { %v470_v43 = vpop.f32.mrf.mxu3  ;;  %v929_v44 = vpop.eup %928  ;;  %v507_v45 = vmul.f32 0.5, %v405_v42  ;;  %618 = vst [vmem:[%s1341_s20 + $0x28] sm:$0xff] %v586_v41 }
  0xf1   : > { %v508_v46 = vmul.f32 0.5, %v470_v43  ;;  %v931_v47 = vpop.eup %930  ;;  %v569_v48 = vadd.f32 1.0, %v929_v44  ;;  %v384_v50 = vpop.f32.mrf.mxu0 }
  0xf2   : > { %v570_v49 = vadd.f32 1.0, %v931_v47  ;;  %936 = vtanh.f32 %v507_v45  ;;  %v449_v51 = vpop.f32.mrf.mxu1  ;;  %v933_v52 = vpop.eup %932  ;;  %v493_v54 = vmul.f32 0.5, %v384_v50 }
  0xf3   : > { %v601_v53 = vmul.f32 0.5, %v569_v48  ;;  %938 = vtanh.f32 %v508_v46  ;;  %v494_v55 = vmul.f32 0.5, %v449_v51  ;;  %v935_v56 = vpop.eup %934  ;;  %v555_v58 = vadd.f32 1.0, %v933_v52 }
  0xf4   : > { %v602_v57 = vmul.f32 0.5, %v570_v49  ;;  %v556_v59 = vadd.f32 1.0, %v935_v56  ;;  %940 = vtanh.f32 %v493_v54 }
  0xf5   : > { %633 = vst [vmem:[%s1341_s20 + $0xa0] sm:$0xff] %v601_v53  ;;  %v587_v60 = vmul.f32 0.5, %v555_v58  ;;  %942 = vtanh.f32 %v494_v55 }
  0xf6   : > { %634 = vst [vmem:[%s1341_s20 + $0xa8] sm:$0xff] %v602_v57  ;;  %v588_v61 = vmul.f32 0.5, %v556_v59 }
  0xf7   : > { %v408_v62 = vpop.f32.mrf.mxu2  ;;  %619 = vst [vmem:[%s1341_s20 + $0x30] sm:$0xff] %v587_v60 }
  0xf8   : > { %v473_v63 = vpop.f32.mrf.mxu3  ;;  %v937_v0 = vpop.eup %936  ;;  %v509_v1 = vmul.f32 0.5, %v408_v62  ;;  %620 = vst [vmem:[%s1341_s20 + $0x38] sm:$0xff] %v588_v61 }
  0xf9   : > { %v510_v2 = vmul.f32 0.5, %v473_v63  ;;  %v939_v3 = vpop.eup %938  ;;  %v571_v4 = vadd.f32 1.0, %v937_v0  ;;  %v387_v6 = vpop.f32.mrf.mxu0 }
  0xfa   : > { %v572_v5 = vadd.f32 1.0, %v939_v3  ;;  %944 = vtanh.f32 %v509_v1  ;;  %v452_v7 = vpop.f32.mrf.mxu1  ;;  %v941_v8 = vpop.eup %940  ;;  %v495_v10 = vmul.f32 0.5, %v387_v6 }
  0xfb   : > { %v603_v9 = vmul.f32 0.5, %v571_v4  ;;  %946 = vtanh.f32 %v510_v2  ;;  %v496_v11 = vmul.f32 0.5, %v452_v7  ;;  %v943_v12 = vpop.eup %942  ;;  %v557_v14 = vadd.f32 1.0, %v941_v8 }
  0xfc   : > { %v604_v13 = vmul.f32 0.5, %v572_v5  ;;  %v558_v15 = vadd.f32 1.0, %v943_v12  ;;  %948 = vtanh.f32 %v495_v10 }
  0xfd   : > { %635 = vst [vmem:[%s1341_s20 + $0xb0] sm:$0xff] %v603_v9  ;;  %v589_v16 = vmul.f32 0.5, %v557_v14  ;;  %950 = vtanh.f32 %v496_v11 }
  0xfe   : > { %636 = vst [vmem:[%s1341_s20 + $0xb8] sm:$0xff] %v604_v13  ;;  %v590_v17 = vmul.f32 0.5, %v558_v15 }
  0xff   : > { %v411_v18 = vpop.f32.mrf.mxu2  ;;  %621 = vst [vmem:[%s1341_s20 + $0x40] sm:$0xff] %v589_v16 }
 0x100   : > { %v476_v19 = vpop.f32.mrf.mxu3  ;;  %v945_v20 = vpop.eup %944  ;;  %v511_v21 = vmul.f32 0.5, %v411_v18  ;;  %622 = vst [vmem:[%s1341_s20 + $0x48] sm:$0xff] %v590_v17 }
 0x101   : > { %v512_v22 = vmul.f32 0.5, %v476_v19  ;;  %v947_v23 = vpop.eup %946  ;;  %v573_v24 = vadd.f32 1.0, %v945_v20  ;;  %v390_v26 = vpop.f32.mrf.mxu0 }
 0x102   : > { %v574_v25 = vadd.f32 1.0, %v947_v23  ;;  %952 = vtanh.f32 %v511_v21  ;;  %v455_v27 = vpop.f32.mrf.mxu1  ;;  %v949_v28 = vpop.eup %948  ;;  %v497_v30 = vmul.f32 0.5, %v390_v26 }
 0x103   : > { %v605_v29 = vmul.f32 0.5, %v573_v24  ;;  %954 = vtanh.f32 %v512_v22  ;;  %v498_v31 = vmul.f32 0.5, %v455_v27  ;;  %v951_v32 = vpop.eup %950  ;;  %v559_v34 = vadd.f32 1.0, %v949_v28 }
 0x104   : > { %v606_v33 = vmul.f32 0.5, %v574_v25  ;;  %v560_v35 = vadd.f32 1.0, %v951_v32  ;;  %956 = vtanh.f32 %v497_v30 }
 0x105   : > { %637 = vst [vmem:[%s1341_s20 + $0xc0] sm:$0xff] %v605_v29  ;;  %v591_v36 = vmul.f32 0.5, %v559_v34  ;;  %958 = vtanh.f32 %v498_v31 }
 0x106   : > { %638 = vst [vmem:[%s1341_s20 + $0xc8] sm:$0xff] %v606_v33  ;;  %v592_v37 = vmul.f32 0.5, %v560_v35 }
 0x107   : > { %v414_v38 = vpop.f32.mrf.mxu2  ;;  %623 = vst [vmem:[%s1341_s20 + $0x50] sm:$0xff] %v591_v36 }
 0x108   : > { %v479_v39 = vpop.f32.mrf.mxu3  ;;  %v953_v40 = vpop.eup %952  ;;  %v513_v41 = vmul.f32 0.5, %v414_v38  ;;  %624 = vst [vmem:[%s1341_s20 + $0x58] sm:$0xff] %v592_v37 }
 0x109   : > { %v514_v42 = vmul.f32 0.5, %v479_v39  ;;  %v955_v43 = vpop.eup %954  ;;  %v575_v44 = vadd.f32 1.0, %v953_v40  ;;  %v393_v46 = vpop.f32.mrf.mxu0 }
 0x10a   : > { %v576_v45 = vadd.f32 1.0, %v955_v43  ;;  %960 = vtanh.f32 %v513_v41  ;;  %v458_v47 = vpop.f32.mrf.mxu1  ;;  %v957_v48 = vpop.eup %956  ;;  %v499_v50 = vmul.f32 0.5, %v393_v46 }
 0x10b   : > { %v607_v49 = vmul.f32 0.5, %v575_v44  ;;  %962 = vtanh.f32 %v514_v42  ;;  %v500_v51 = vmul.f32 0.5, %v458_v47  ;;  %v959_v52 = vpop.eup %958  ;;  %v561_v54 = vadd.f32 1.0, %v957_v48 }
 0x10c   : > { %v608_v53 = vmul.f32 0.5, %v576_v45  ;;  %v562_v55 = vadd.f32 1.0, %v959_v52  ;;  %964 = vtanh.f32 %v499_v50 }
 0x10d   : > { %639 = vst [vmem:[%s1341_s20 + $0xd0] sm:$0xff] %v607_v49  ;;  %v593_v56 = vmul.f32 0.5, %v561_v54  ;;  %966 = vtanh.f32 %v500_v51 }
 0x10e   : > { %640 = vst [vmem:[%s1341_s20 + $0xd8] sm:$0xff] %v608_v53  ;;  %v594_v57 = vmul.f32 0.5, %v562_v55 }
 0x10f   : > { %v417_v58 = vpop.f32.mrf.mxu2  ;;  %625 = vst [vmem:[%s1341_s20 + $0x60] sm:$0xff] %v593_v56 }
 0x110   : > { %v482_v59 = vpop.f32.mrf.mxu3  ;;  %v961_v60 = vpop.eup %960  ;;  %v515_v61 = vmul.f32 0.5, %v417_v58  ;;  %626 = vst [vmem:[%s1341_s20 + $0x68] sm:$0xff] %v594_v57 }
 0x111   : > { %v516_v62 = vmul.f32 0.5, %v482_v59  ;;  %v963_v63 = vpop.eup %962  ;;  %v577_v0 = vadd.f32 1.0, %v961_v60 }
 0x112   : > { %v578_v1 = vadd.f32 1.0, %v963_v63  ;;  %968 = vtanh.f32 %v515_v61  ;;  %v965_v2 = vpop.eup %964 }
 0x113   : > { %v609_v3 = vmul.f32 0.5, %v577_v0  ;;  %970 = vtanh.f32 %v516_v62  ;;  %v967_v4 = vpop.eup %966  ;;  %v563_v6 = vadd.f32 1.0, %v965_v2 }
 0x114   : > { %v610_v5 = vmul.f32 0.5, %v578_v1  ;;  %v564_v7 = vadd.f32 1.0, %v967_v4 }
 0x115   : > { %641 = vst [vmem:[%s1341_s20 + $0xe0] sm:$0xff] %v609_v3  ;;  %v595_v8 = vmul.f32 0.5, %v563_v6 }
 0x116   : > { %642 = vst [vmem:[%s1341_s20 + $0xe8] sm:$0xff] %v610_v5  ;;  %v596_v9 = vmul.f32 0.5, %v564_v7 }
 0x117   : > { %627 = vst [vmem:[%s1341_s20 + $0x70] sm:$0xff] %v595_v8 }
 0x118   : > { %v969_v10 = vpop.eup %968  ;;  %628 = vst [vmem:[%s1341_s20 + $0x78] sm:$0xff] %v596_v9 }
 0x119   : > { %v971_v11 = vpop.eup %970  ;;  %v579_v12 = vadd.f32 1.0, %v969_v10 }
 0x11a   : > { %v580_v13 = vadd.f32 1.0, %v971_v11 }
 0x11b   : > { %v611_v14 = vmul.f32 0.5, %v579_v12 }
 0x11c   : > { %v612_v15 = vmul.f32 0.5, %v580_v13 }
 0x11d   : > { %643 = vst [vmem:[%s1341_s20 + $0xf0] sm:$0xff] %v611_v14 }
 0x11e   : > { %644 = vst [vmem:[%s1341_s20 + $0xf8] sm:$0xff] %v612_v15 }
 0x11f   : > { %999 = shalt.err (!%p996_p5)
}
 0x120   : > { %s1052_s15 = smov 256   ;;  %s1053_s7 = smov 16  }
 0x121   : > { %851 = dma.vmem_to_hbm [thread:$0]  (%p1109_p4), %s662_s12, 4096, %s664_s27, %s646_s28, %s1052_s15, %s1052_s15, %s1053_s7  }
 0x122 PF: > { %p857_p6 = scmp.ge.s32.totalorder %s1050_s14, 2  ;;  %s678_s16 = sand.u32 1, %s1030_s9  }
 0x123   : > { %s679_s18 = scalar_lea.sflag [#allocation3], %s678_s16 }
 0x124   : > { %p854_p7 = pnand %p857_p6, %p1116_p8 }
 0x126   : > { %p855_p9 = pneg %p854_p7 }
 0x128   : > { %1025 = dma.done.wait (%p855_p9), %s679_s18, 4096  }
 0x129   : > { %1027 = vsyncadd (%p855_p9), %s679_s18, 4294963200  ;;  %s15_s14 = sadd.s32 1, %s1050_s14   ;;  %s1419_s9 = smov %s1034_s10 }
 0x12a   : > { %p12_p10 = scmp.ge.s32.totalorder %s15_s14, 4   ;;  %s1420_s10 = smov %s1038_s11 }
 0x12b   : > { %s1421_s11 = smov %s1122_s22  ;;  %s1422_s12 = smov %s1046_s13 }
 0x12c   : > { %s1423_s13 = smov %s1425_s17  ;;  %14 = sbr.rel (!%p12_p10) target bundleno = 4 (0x4), region = 64 }
 0x131   :  { %685 = vsyncpa [#allocation3], 1 }
 0x132   :  { %687 = vsyncpa [#allocation3 + $0x1], 1 }

// kernel: tpu_custom_call.1
= control target key start
LH: loop header
LB: loop body
LE: loop exit
PB: predicated region body
PF: predicated region fallthrough
CT: control target
= control target key end

     0   :  { %7 = vsyncpa [#allocation3], 0  ;;  %s1414_s0 = inlined_call_operand.vmem [shape: f32[256,64], index: 0, kind: input, shape index: {}]   ;;  %s1415_s1 = inlined_call_operand.vmem [shape: f32[256,64], index: 1, kind: input, shape index: {}]   ;;  %s1416_s2 = inlined_call_operand.hbm [shape: f32[256,256], index: 2, kind: output, shape index: {}]  }
   0x1   :  { %9 = vsyncpa [#allocation3 + $0x1], 0  ;;  %s1069_s9 = smov 0   ;;  %s1071_s10 = smov 0  }
   0x2   :  { %s1073_s11 = smov 0   ;;  %s1075_s12 = smov 0  }
   0x3   :  { %s1077_s13 = smov 0   ;;  %s1079_s14 = smov 0  }
   0x4 LB: > { %s739_s15 = sadd.s32 4294967295, %s1050_s14   ;;  %s740_s16 = sadd.s32 4294967294, %s1050_s14   ;;  %s1050_s14 = sphi %s1079_s14, %s15_s14   ;;  %s1046_s13 = sphi %s1077_s13, %s1423_s13   ;;  %s1042_s12 = sphi %s1075_s12, %s1422_s12   ;;  %s1038_s11 = sphi %s1073_s11, %s1421_s11   ;;  %s1034_s10 = sphi %s1071_s10, %s1420_s10   ;;  %s1030_s9 = sphi %s1069_s9, %s1419_s9  }
   0x5   : > { %s27_s17 = sadd.s32 1, %s1046_s13  ;;  %s83_s18 = sadd.s32 1, %s1038_s11 }
   0x6   : > { %p29_p0 = scmp.ge.s32.totalorder %s27_s17, 2  ;;  %p93_p1 = scmp.ne.s32.totalorder %s1038_s11, %s1034_s10 }
   0x7   : > { %p94_p2 = scmp.eq.s32.totalorder %s739_s15, 1  ;;  %p99_p3 = scmp.ne.s32.totalorder %s1034_s10, %s1030_s9 }
   0x8   : > { %s1425_s17 = smov (%p29_p0, %s27_s17), 0  ;;  %p100_p5 = scmp.eq.s32.totalorder %s740_s16, 1 }
   0x9   : > { %p1109_p4 = por %p94_p2, %p93_p1  ;;  %s78_s20 = ssub.s32 %s1046_s13, %s1425_s17 }
   0xa   : > { %p743_p6 = scmp.ge.s32.totalorder %s1050_s14, 1  ;;  %p81_p7 = scmp.eq.s32.totalorder %s78_s20, 0 }
   0xb   : > { %p1116_p8 = por %p100_p5, %p99_p3  ;;  %p130_p9 = scmp.lt.s32.totalorder %s1050_s14, 3 }
   0xc   : > { %s1122_s22 = scalar_select %p81_p7, %s1038_s11, %s83_s18  }
   0xd   : > { %p131_p10 = pnand %p743_p6, %p130_p9 }
   0xe   : > { %s745_s7 = sshll.u32 (!%p131_p10), %s1042_s12, 4  ;;  %s149_s16 = sand.u32 (!%p131_p10), 1, %s1034_s10  }
   0xf   : > { %134 = sbr.rel (%p131_p10) target bundleno = 290 (0x122), region = 28  ;;  %p153_p11 = scmp.lt.s32.totalorder (!%p131_p10), %s745_s7, 31 }
  0x10   : > { %s744_s18 = sshll.u32 (!%p131_p10), %s149_s16, 8  ;;  %s818_s23 = sshll.u32 (!%p131_p10), %s1042_s12, 8 }
  0x11   : > { %s1341_s20 = scalar_lea.vmem (!%p131_p10), [#allocation2], %s744_s18  ;;  %s660_s26 = scalar_lea.hbm (!%p131_p10), %s1416_s2, %s818_s23 }
  0x12   : > { %s661_s12 = sshll.u32 (!%p131_p10), %s1341_s20, 4  ;;  %s663_s27 = sshll.u32 (!%p131_p10), %s660_s26, 4  ;;  %s662_s12 = int_to_ptr.vmem [resolvable:$true] %s661_s12  ;;  %s664_s27 = int_to_ptr.hbm [resolvable:$true] %s663_s27 }
  0x13   : > { %s646_s28 = scalar_lea.sflag (!%p131_p10), [#allocation3], %s149_s16  ;;  %s986_s29 = sshra.s32 (!%p131_p10), %s664_s27, 4  ;;  %s987_s29 = int_to_ptr.hbm [resolvable:$true] %s986_s29 }
  0x14   : > { %v193_v0 = vld [vmem:[%s1415_s1 + $0x78] sm:$0xff]  ;;  %vm210_vm0 = vcmask 523264   ;;  %v192_v2 = vld [vmem:[%s1415_s1 + $0x70] sm:$0xff]  ;;  %v191_v4 = vld [vmem:[%s1415_s1 + $0x68] sm:$0xff]  ;;  %s1427_s7 = smov (!%p153_p11, %s745_s7), 31  ;;  %s992_s5 = scalar_lea.hbm %s1416_s2, 512 }
  0x15   : > { %v209_v1 = vld [vmem:[%s1415_s1 + $0xf8] sm:$0xff]  ;;  %819 = vmatpush.xpose.msk.msra.mxu2 %vm210_vm0, %v193_v0  ;;  %v208_v3 = vld [vmem:[%s1415_s1 + $0xf0] sm:$0xff]  ;;  %747 = vmatpush.xpose.msk.msra.mxu0 %vm210_vm0, %v193_v0  ;;  %v207_v5 = vld [vmem:[%s1415_s1 + $0xe8] sm:$0xff]  ;;  %s746_s30 = sshll.u32 %s1427_s7, 3  ;;  %p993_p1 = scmp.lt.s32.totalorder %s987_s29, %s1416_s2 }
  0x16   : > { %835 = vmatpush.xpose.msk.msra.mxu3 %vm210_vm0, %v209_v1  ;;  %779 = vmatpush.xpose.msk.msra.mxu1 %vm210_vm0, %v209_v1  ;;  %v190_v6 = vld [vmem:[%s1415_s1 + $0x60] sm:$0xff]  ;;  %v189_v8 = vld [vmem:[%s1415_s1 + $0x58] sm:$0xff]  ;;  %v188_v10 = vld [vmem:[%s1415_s1 + $0x50] sm:$0xff]  ;;  %s1284_s7 = scalar_lea.vmem %s1414_s0, %s746_s30  ;;  %s988_s30 = scalar_lea.hbm %s987_s29, 256 }
  0x17   : > { %v206_v7 = vld [vmem:[%s1415_s1 + $0xe0] sm:$0xff]  ;;  %v205_v9 = vld [vmem:[%s1415_s1 + $0xd8] sm:$0xff]  ;;  %v204_v11 = vld [vmem:[%s1415_s1 + $0xd0] sm:$0xff]  ;;  %p989_p12 = scmp.ne.s32.totalorder %s987_s29, %s988_s30  ;;  %p994_p2 = scmp.lt.s32.totalorder %s992_s5, %s988_s30 }
  0x18   : > { %v187_v12 = vld [vmem:[%s1415_s1 + $0x48] sm:$0xff]  ;;  %v186_v14 = vld [vmem:[%s1415_s1 + $0x40] sm:$0xff]  ;;  %v185_v16 = vld [vmem:[%s1415_s1 + $0x38] sm:$0xff] }
  0x19   : > { %820 = vmatpush.xpose.msk.msra.mxu2 %vm210_vm0, %v192_v2  ;;  %748 = vmatpush.xpose.msk.msra.mxu0 %vm210_vm0, %v192_v2  ;;  %v203_v13 = vld [vmem:[%s1415_s1 + $0xc8] sm:$0xff]  ;;  %v202_v15 = vld [vmem:[%s1415_s1 + $0xc0] sm:$0xff]  ;;  %v201_v17 = vld [vmem:[%s1415_s1 + $0xb8] sm:$0xff]  ;;  %p990_p13 = pnand %p989_p12, %p1109_p4  ;;  %p995_p3 = por %p994_p2, %p993_p1 }
  0x1a   : > { %836 = vmatpush.xpose.msk.msra.mxu3 %vm210_vm0, %v208_v3  ;;  %780 = vmatpush.xpose.msk.msra.mxu1 %vm210_vm0, %v208_v3  ;;  %v184_v18 = vld [vmem:[%s1415_s1 + $0x30] sm:$0xff]  ;;  %v183_v20 = vld [vmem:[%s1415_s1 + $0x28] sm:$0xff]  ;;  %v182_v22 = vld [vmem:[%s1415_s1 + $0x20] sm:$0xff] }
  0x1b   : > { %v200_v19 = vld [vmem:[%s1415_s1 + $0xb0] sm:$0xff]  ;;  %v199_v21 = vld [vmem:[%s1415_s1 + $0xa8] sm:$0xff]  ;;  %v198_v23 = vld [vmem:[%s1415_s1 + $0xa0] sm:$0xff]  ;;  %p991_p0 = pneg %p990_p13 }
  0x1c   : > { %v181_v24 = vld [vmem:[%s1415_s1 + $0x18] sm:$0xff]  ;;  %v180_v26 = vld [vmem:[%s1415_s1 + $0x10] sm:$0xff]  ;;  %v179_v28 = vld [vmem:[%s1415_s1 + $0x8] sm:$0xff] }
  0x1d   : > { %821 = vmatpush.xpose.msk.msra.mxu2 %vm210_vm0, %v191_v4  ;;  %749 = vmatpush.xpose.msk.msra.mxu0 %vm210_vm0, %v191_v4  ;;  %v197_v25 = vld [vmem:[%s1415_s1 + $0x98] sm:$0xff]  ;;  %v196_v27 = vld [vmem:[%s1415_s1 + $0x90] sm:$0xff]  ;;  %v195_v29 = vld [vmem:[%s1415_s1 + $0x88] sm:$0xff]  ;;  %p996_p5 = pnand %p995_p3, %p991_p0 }
  0x1e   : > { %837 = vmatpush.xpose.msk.msra.mxu3 %vm210_vm0, %v207_v5  ;;  %781 = vmatpush.xpose.msk.msra.mxu1 %vm210_vm0, %v207_v5  ;;  %v178_v30 = vld [vmem:[%s1415_s1] sm:$0xff]  ;;  %v169_v34 = vld [vmem:[%s1284_s7 + $0x48] sm:$0xff]  ;;  %v170_v36 = vld [vmem:[%s1284_s7 + $0x50] sm:$0xff] }
  0x1f   : > { %v194_v31 = vld [vmem:[%s1415_s1 + $0x80] sm:$0xff]  ;;  %v161_v35 = vld [vmem:[%s1284_s7 + $0x8] sm:$0xff]  ;;  %v162_v37 = vld [vmem:[%s1284_s7 + $0x10] sm:$0xff] }
  0x20   : > { %v168_v32 = vld [vmem:[%s1284_s7 + $0x40] sm:$0xff]  ;;  %v171_v38 = vld [vmem:[%s1284_s7 + $0x58] sm:$0xff]  ;;  %v173_v42 = vld [vmem:[%s1284_s7 + $0x68] sm:$0xff] }
  0x21   : > { %822 = vmatpush.xpose.msk.msra.mxu2 %vm210_vm0, %v190_v6  ;;  %750 = vmatpush.xpose.msk.msra.mxu0 %vm210_vm0, %v190_v6  ;;  %v160_v33 = vld [vmem:[%s1284_s7] sm:$0xff]  ;;  %v163_v39 = vld [vmem:[%s1284_s7 + $0x18] sm:$0xff]  ;;  %v165_v43 = vld [vmem:[%s1284_s7 + $0x28] sm:$0xff] }
  0x22   : > { %838 = vmatpush.xpose.msk.msra.mxu3 %vm210_vm0, %v206_v7  ;;  %782 = vmatpush.xpose.msk.msra.mxu1 %vm210_vm0, %v206_v7  ;;  %v172_v40 = vld [vmem:[%s1284_s7 + $0x60] sm:$0xff]  ;;  %v174_v44 = vld [vmem:[%s1284_s7 + $0x70] sm:$0xff]  ;;  %v175_v46 = vld [vmem:[%s1284_s7 + $0x78] sm:$0xff] }
  0x23   : > { %v164_v41 = vld [vmem:[%s1284_s7 + $0x20] sm:$0xff]  ;;  %v166_v45 = vld [vmem:[%s1284_s7 + $0x30] sm:$0xff]  ;;  %v167_v47 = vld [vmem:[%s1284_s7 + $0x38] sm:$0xff] }
  0x25   : > { %823 = vmatpush.xpose.msk.msra.mxu2 %vm210_vm0, %v189_v8  ;;  %751 = vmatpush.xpose.msk.msra.mxu0 %vm210_vm0, %v189_v8 }
  0x26   : > { %839 = vmatpush.xpose.msk.msra.mxu3 %vm210_vm0, %v205_v9  ;;  %783 = vmatpush.xpose.msk.msra.mxu1 %vm210_vm0, %v205_v9 }
  0x29   : > { %824 = vmatpush.xpose.msk.msra.mxu2 %vm210_vm0, %v188_v10  ;;  %752 = vmatpush.xpose.msk.msra.mxu0 %vm210_vm0, %v188_v10 }
  0x2a   : > { %840 = vmatpush.xpose.msk.msra.mxu3 %vm210_vm0, %v204_v11  ;;  %784 = vmatpush.xpose.msk.msra.mxu1 %vm210_vm0, %v204_v11 }
  0x2d   : > { %825 = vmatpush.xpose.msk.msra.mxu2 %vm210_vm0, %v187_v12  ;;  %753 = vmatpush.xpose.msk.msra.mxu0 %vm210_vm0, %v187_v12 }
  0x2e   : > { %841 = vmatpush.xpose.msk.msra.mxu3 %vm210_vm0, %v203_v13  ;;  %785 = vmatpush.xpose.msk.msra.mxu1 %vm210_vm0, %v203_v13 }
  0x31   : > { %826 = vmatpush.xpose.msk.msra.mxu2 %vm210_vm0, %v186_v14  ;;  %754 = vmatpush.xpose.msk.msra.mxu0 %vm210_vm0, %v186_v14 }
  0x32   : > { %842 = vmatpush.xpose.msk.msra.mxu3 %vm210_vm0, %v202_v15  ;;  %786 = vmatpush.xpose.msk.msra.mxu1 %vm210_vm0, %v202_v15 }
  0x35   : > { %827 = vmatpush.xpose.msk.msra.mxu2 %vm210_vm0, %v185_v16  ;;  %755 = vmatpush.xpose.msk.msra.mxu0 %vm210_vm0, %v185_v16 }
  0x36   : > { %843 = vmatpush.xpose.msk.msra.mxu3 %vm210_vm0, %v201_v17  ;;  %787 = vmatpush.xpose.msk.msra.mxu1 %vm210_vm0, %v201_v17 }
  0x39   : > { %828 = vmatpush.xpose.msk.msra.mxu2 %vm210_vm0, %v184_v18  ;;  %756 = vmatpush.xpose.msk.msra.mxu0 %vm210_vm0, %v184_v18 }
  0x3a   : > { %844 = vmatpush.xpose.msk.msra.mxu3 %vm210_vm0, %v200_v19  ;;  %788 = vmatpush.xpose.msk.msra.mxu1 %vm210_vm0, %v200_v19 }
  0x3d   : > { %829 = vmatpush.xpose.msk.msra.mxu2 %vm210_vm0, %v183_v20  ;;  %757 = vmatpush.xpose.msk.msra.mxu0 %vm210_vm0, %v183_v20 }
  0x3e   : > { %845 = vmatpush.xpose.msk.msra.mxu3 %vm210_vm0, %v199_v21  ;;  %789 = vmatpush.xpose.msk.msra.mxu1 %vm210_vm0, %v199_v21 }
  0x41   : > { %830 = vmatpush.xpose.msk.msra.mxu2 %vm210_vm0, %v182_v22  ;;  %758 = vmatpush.xpose.msk.msra.mxu0 %vm210_vm0, %v182_v22 }
  0x42   : > { %846 = vmatpush.xpose.msk.msra.mxu3 %vm210_vm0, %v198_v23  ;;  %790 = vmatpush.xpose.msk.msra.mxu1 %vm210_vm0, %v198_v23 }
  0x45   : > { %831 = vmatpush.xpose.msk.msra.mxu2 %vm210_vm0, %v181_v24  ;;  %759 = vmatpush.xpose.msk.msra.mxu0 %vm210_vm0, %v181_v24 }
  0x46   : > { %847 = vmatpush.xpose.msk.msra.mxu3 %vm210_vm0, %v197_v25  ;;  %791 = vmatpush.xpose.msk.msra.mxu1 %vm210_vm0, %v197_v25 }
  0x49   : > { %832 = vmatpush.xpose.msk.msra.mxu2 %vm210_vm0, %v180_v26  ;;  %760 = vmatpush.xpose.msk.msra.mxu0 %vm210_vm0, %v180_v26 }
  0x4a   : > { %848 = vmatpush.xpose.msk.msra.mxu3 %vm210_vm0, %v196_v27  ;;  %792 = vmatpush.xpose.msk.msra.mxu1 %vm210_vm0, %v196_v27 }
  0x4d   : > { %833 = vmatpush.xpose.msk.msra.mxu2 %vm210_vm0, %v179_v28  ;;  %761 = vmatpush.xpose.msk.msra.mxu0 %vm210_vm0, %v179_v28 }
  0x4e   : > { %849 = vmatpush.xpose.msk.msra.mxu3 %vm210_vm0, %v195_v29  ;;  %793 = vmatpush.xpose.msk.msra.mxu1 %vm210_vm0, %v195_v29 }
  0x51   : > { %834 = vmatpush.xpose.msk.msra.mxu2 %vm210_vm0, %v178_v30  ;;  %762 = vmatpush.xpose.msk.msra.mxu0 %vm210_vm0, %v178_v30 }
  0x52   : > { %850 = vmatpush.xpose.msk.msra.mxu3 %vm210_vm0, %v194_v31  ;;  %794 = vmatpush.xpose.msk.msra.mxu1 %vm210_vm0, %v194_v31 }
  0x54   : > { %771 = vmatmul.msk.f32.vlgmr.msra.gmra.mxu2 %vm210_vm0, %v168_v32  ;;  %763 = vmatmul.msk.f32.vlgmr.msra.gmra.mxu0 %vm210_vm0, %v160_v33 }
  0x55   : > { %803 = vmatmul.msk.f32.vlgmr.msra.gmra.mxu3 %vm210_vm0, %v168_v32  ;;  %795 = vmatmul.msk.f32.vlgmr.msra.gmra.mxu1 %vm210_vm0, %v160_v33 }
  0x5c   : > { %772 = vmatmul.msk.f32.gmra.mxu2 %vm210_vm0, %v169_v34  ;;  %764 = vmatmul.msk.f32.gmra.mxu0 %vm210_vm0, %v161_v35 }
  0x5d   : > { %804 = vmatmul.msk.f32.gmra.mxu3 %vm210_vm0, %v169_v34  ;;  %796 = vmatmul.msk.f32.gmra.mxu1 %vm210_vm0, %v161_v35 }
  0x64   : > { %773 = vmatmul.msk.f32.gmra.mxu2 %vm210_vm0, %v170_v36  ;;  %765 = vmatmul.msk.f32.gmra.mxu0 %vm210_vm0, %v162_v37 }
  0x65   : > { %805 = vmatmul.msk.f32.gmra.mxu3 %vm210_vm0, %v170_v36  ;;  %797 = vmatmul.msk.f32.gmra.mxu1 %vm210_vm0, %v162_v37 }
  0x6c   : > { %774 = vmatmul.msk.f32.gmra.mxu2 %vm210_vm0, %v171_v38  ;;  %766 = vmatmul.msk.f32.gmra.mxu0 %vm210_vm0, %v163_v39 }
  0x6d   : > { %806 = vmatmul.msk.f32.gmra.mxu3 %vm210_vm0, %v171_v38  ;;  %798 = vmatmul.msk.f32.gmra.mxu1 %vm210_vm0, %v163_v39 }
  0x74   : > { %775 = vmatmul.msk.f32.gmra.mxu2 %vm210_vm0, %v172_v40  ;;  %767 = vmatmul.msk.f32.gmra.mxu0 %vm210_vm0, %v164_v41 }
  0x75   : > { %807 = vmatmul.msk.f32.gmra.mxu3 %vm210_vm0, %v172_v40  ;;  %799 = vmatmul.msk.f32.gmra.mxu1 %vm210_vm0, %v164_v41 }
  0x7c   : > { %776 = vmatmul.msk.f32.gmra.mxu2 %vm210_vm0, %v173_v42  ;;  %768 = vmatmul.msk.f32.gmra.mxu0 %vm210_vm0, %v165_v43 }
  0x7d   : > { %808 = vmatmul.msk.f32.gmra.mxu3 %vm210_vm0, %v173_v42  ;;  %800 = vmatmul.msk.f32.gmra.mxu1 %vm210_vm0, %v165_v43 }
  0x84   : > { %777 = vmatmul.msk.f32.gmra.mxu2 %vm210_vm0, %v174_v44  ;;  %769 = vmatmul.msk.f32.gmra.mxu0 %vm210_vm0, %v166_v45 }
  0x85   : > { %809 = vmatmul.msk.f32.gmra.mxu3 %vm210_vm0, %v174_v44  ;;  %801 = vmatmul.msk.f32.gmra.mxu1 %vm210_vm0, %v166_v45 }
  0x8c   : > { %778 = vmatmul.msk.f32.gmra.mxu2 %vm210_vm0, %v175_v46  ;;  %770 = vmatmul.msk.f32.gmra.mxu0 %vm210_vm0, %v167_v47 }
  0x8d   : > { %810 = vmatmul.msk.f32.gmra.mxu3 %vm210_vm0, %v175_v46  ;;  %802 = vmatmul.msk.f32.gmra.mxu1 %vm210_vm0, %v167_v47 }
  0xd1   : > { %v372_v48 = vpop.f32.mrf.mxu0 }
  0xd2   : > { %v437_v49 = vpop.f32.mrf.mxu1  ;;  %v485_v50 = vmul.f32 0.5, %v372_v48 }
  0xd3   : > { %v486_v51 = vmul.f32 0.5, %v437_v49 }
  0xd4   : > { %908 = vtanh.f32 %v485_v50 }
  0xd5   : > { %910 = vtanh.f32 %v486_v51 }
  0xd7   : > { %v396_v52 = vpop.f32.mrf.mxu2 }
  0xd8   : > { %v461_v53 = vpop.f32.mrf.mxu3  ;;  %v501_v54 = vmul.f32 0.5, %v396_v52 }
  0xd9   : > { %v502_v55 = vmul.f32 0.5, %v461_v53  ;;  %v375_v56 = vpop.f32.mrf.mxu0 }
  0xda   : > { %912 = vtanh.f32 %v501_v54  ;;  %v440_v57 = vpop.f32.mrf.mxu1  ;;  %v909_v58 = vpop.eup %908  ;;  %v487_v59 = vmul.f32 0.5, %v375_v56 }
  0xdb   : > { %914 = vtanh.f32 %v502_v55  ;;  %v488_v60 = vmul.f32 0.5, %v440_v57  ;;  %v911_v61 = vpop.eup %910  ;;  %v549_v62 = vadd.f32 1.0, %v909_v58 }
  0xdc   : > { %v550_v63 = vadd.f32 1.0, %v911_v61  ;;  %916 = vtanh.f32 %v487_v59 }
  0xdd   : > { %v581_v0 = vmul.f32 0.5, %v549_v62  ;;  %918 = vtanh.f32 %v488_v60 }
  0xde   : > { %v582_v1 = vmul.f32 0.5, %v550_v63 }
  0xdf   : > { %v399_v2 = vpop.f32.mrf.mxu2  ;;  %613 = vst [vmem:[%s1341_s20] sm:$0xff] %v581_v0 }
  0xe0   : > { %v464_v3 = vpop.f32.mrf.mxu3  ;;  %v913_v4 = vpop.eup %912  ;;  %v503_v5 = vmul.f32 0.5, %v399_v2  ;;  %614 = vst [vmem:[%s1341_s20 + $0x8] sm:$0xff] %v582_v1 }
  0xe1   : > { %v504_v6 = vmul.f32 0.5, %v464_v3  ;;  %v915_v7 = vpop.eup %914  ;;  %v565_v8 = vadd.f32 1.0, %v913_v4  ;;  %v378_v10 = vpop.f32.mrf.mxu0 }
  0xe2   : > { %v566_v9 = vadd.f32 1.0, %v915_v7  ;;  %920 = vtanh.f32 %v503_v5  ;;  %v443_v11 = vpop.f32.mrf.mxu1  ;;  %v917_v12 = vpop.eup %916  ;;  %v489_v14 = vmul.f32 0.5, %v378_v10 }
  0xe3   : > { %v597_v13 = vmul.f32 0.5, %v565_v8  ;;  %922 = vtanh.f32 %v504_v6  ;;  %v490_v15 = vmul.f32 0.5, %v443_v11  ;;  %v919_v16 = vpop.eup %918  ;;  %v551_v18 = vadd.f32 1.0, %v917_v12 }
  0xe4   : > { %v598_v17 = vmul.f32 0.5, %v566_v9  ;;  %v552_v19 = vadd.f32 1.0, %v919_v16  ;;  %924 = vtanh.f32 %v489_v14 }
  0xe5   : > { %629 = vst [vmem:[%s1341_s20 + $0x80] sm:$0xff] %v597_v13  ;;  %v583_v20 = vmul.f32 0.5, %v551_v18  ;;  %926 = vtanh.f32 %v490_v15 }
  0xe6   : > { %630 = vst [vmem:[%s1341_s20 + $0x88] sm:$0xff] %v598_v17  ;;  %v584_v21 = vmul.f32 0.5, %v552_v19 }
  0xe7   : > { %v402_v22 = vpop.f32.mrf.mxu2  ;;  %615 = vst [vmem:[%s1341_s20 + $0x10] sm:$0xff] %v583_v20 }
  0xe8   : > { %v467_v23 = vpop.f32.mrf.mxu3  ;;  %v921_v24 = vpop.eup %920  ;;  %v505_v25 = vmul.f32 0.5, %v402_v22  ;;  %616 = vst [vmem:[%s1341_s20 + $0x18] sm:$0xff] %v584_v21 }
  0xe9   : > { %v506_v26 = vmul.f32 0.5, %v467_v23  ;;  %v923_v27 = vpop.eup %922  ;;  %v567_v28 = vadd.f32 1.0, %v921_v24  ;;  %v381_v30 = vpop.f32.mrf.mxu0 }
  0xea   : > { %v568_v29 = vadd.f32 1.0, %v923_v27  ;;  %928 = vtanh.f32 %v505_v25  ;;  %v446_v31 = vpop.f32.mrf.mxu1  ;;  %v925_v32 = vpop.eup %924  ;;  %v491_v34 = vmul.f32 0.5, %v381_v30 }
  0xeb   : > { %v599_v33 = vmul.f32 0.5, %v567_v28  ;;  %930 = vtanh.f32 %v506_v26  ;;  %v492_v35 = vmul.f32 0.5, %v446_v31  ;;  %v927_v36 = vpop.eup %926  ;;  %v553_v38 = vadd.f32 1.0, %v925_v32 }
  0xec   : > { %v600_v37 = vmul.f32 0.5, %v568_v29  ;;  %v554_v39 = vadd.f32 1.0, %v927_v36  ;;  %932 = vtanh.f32 %v491_v34 }
  0xed   : > { %631 = vst [vmem:[%s1341_s20 + $0x90] sm:$0xff] %v599_v33  ;;  %v585_v40 = vmul.f32 0.5, %v553_v38  ;;  %934 = vtanh.f32 %v492_v35 }
  0xee   : > { %632 = vst [vmem:[%s1341_s20 + $0x98] sm:$0xff] %v600_v37  ;;  %v586_v41 = vmul.f32 0.5, %v554_v39 }
  0xef   : > { %v405_v42 = vpop.f32.mrf.mxu2  ;;  %617 = vst [vmem:[%s1341_s20 + $0x20] sm:$0xff] %v585_v40 }
  0xf0   : > { %v470_v43 = vpop.f32.mrf.mxu3  ;;  %v929_v44 = vpop.eup %928  ;;  %v507_v45 = vmul.f32 0.5, %v405_v42  ;;  %618 = vst [vmem:[%s1341_s20 + $0x28] sm:$0xff] %v586_v41 }
  0xf1   : > { %v508_v46 = vmul.f32 0.5, %v470_v43  ;;  %v931_v47 = vpop.eup %930  ;;  %v569_v48 = vadd.f32 1.0, %v929_v44  ;;  %v384_v50 = vpop.f32.mrf.mxu0 }
  0xf2   : > { %v570_v49 = vadd.f32 1.0, %v931_v47  ;;  %936 = vtanh.f32 %v507_v45  ;;  %v449_v51 = vpop.f32.mrf.mxu1  ;;  %v933_v52 = vpop.eup %932  ;;  %v493_v54 = vmul.f32 0.5, %v384_v50 }
  0xf3   : > { %v601_v53 = vmul.f32 0.5, %v569_v48  ;;  %938 = vtanh.f32 %v508_v46  ;;  %v494_v55 = vmul.f32 0.5, %v449_v51  ;;  %v935_v56 = vpop.eup %934  ;;  %v555_v58 = vadd.f32 1.0, %v933_v52 }
  0xf4   : > { %v602_v57 = vmul.f32 0.5, %v570_v49  ;;  %v556_v59 = vadd.f32 1.0, %v935_v56  ;;  %940 = vtanh.f32 %v493_v54 }
  0xf5   : > { %633 = vst [vmem:[%s1341_s20 + $0xa0] sm:$0xff] %v601_v53  ;;  %v587_v60 = vmul.f32 0.5, %v555_v58  ;;  %942 = vtanh.f32 %v494_v55 }
  0xf6   : > { %634 = vst [vmem:[%s1341_s20 + $0xa8] sm:$0xff] %v602_v57  ;;  %v588_v61 = vmul.f32 0.5, %v556_v59 }
  0xf7   : > { %v408_v62 = vpop.f32.mrf.mxu2  ;;  %619 = vst [vmem:[%s1341_s20 + $0x30] sm:$0xff] %v587_v60 }
  0xf8   : > { %v473_v63 = vpop.f32.mrf.mxu3  ;;  %v937_v0 = vpop.eup %936  ;;  %v509_v1 = vmul.f32 0.5, %v408_v62  ;;  %620 = vst [vmem:[%s1341_s20 + $0x38] sm:$0xff] %v588_v61 }
  0xf9   : > { %v510_v2 = vmul.f32 0.5, %v473_v63  ;;  %v939_v3 = vpop.eup %938  ;;  %v571_v4 = vadd.f32 1.0, %v937_v0  ;;  %v387_v6 = vpop.f32.mrf.mxu0 }
  0xfa   : > { %v572_v5 = vadd.f32 1.0, %v939_v3  ;;  %944 = vtanh.f32 %v509_v1  ;;  %v452_v7 = vpop.f32.mrf.mxu1  ;;  %v941_v8 = vpop.eup %940  ;;  %v495_v10 = vmul.f32 0.5, %v387_v6 }
  0xfb   : > { %v603_v9 = vmul.f32 0.5, %v571_v4  ;;  %946 = vtanh.f32 %v510_v2  ;;  %v496_v11 = vmul.f32 0.5, %v452_v7  ;;  %v943_v12 = vpop.eup %942  ;;  %v557_v14 = vadd.f32 1.0, %v941_v8 }
  0xfc   : > { %v604_v13 = vmul.f32 0.5, %v572_v5  ;;  %v558_v15 = vadd.f32 1.0, %v943_v12  ;;  %948 = vtanh.f32 %v495_v10 }
  0xfd   : > { %635 = vst [vmem:[%s1341_s20 + $0xb0] sm:$0xff] %v603_v9  ;;  %v589_v16 = vmul.f32 0.5, %v557_v14  ;;  %950 = vtanh.f32 %v496_v11 }
  0xfe   : > { %636 = vst [vmem:[%s1341_s20 + $0xb8] sm:$0xff] %v604_v13  ;;  %v590_v17 = vmul.f32 0.5, %v558_v15 }
  0xff   : > { %v411_v18 = vpop.f32.mrf.mxu2  ;;  %621 = vst [vmem:[%s1341_s20 + $0x40] sm:$0xff] %v589_v16 }
 0x100   : > { %v476_v19 = vpop.f32.mrf.mxu3  ;;  %v945_v20 = vpop.eup %944  ;;  %v511_v21 = vmul.f32 0.5, %v411_v18  ;;  %622 = vst [vmem:[%s1341_s20 + $0x48] sm:$0xff] %v590_v17 }
 0x101   : > { %v512_v22 = vmul.f32 0.5, %v476_v19  ;;  %v947_v23 = vpop.eup %946  ;;  %v573_v24 = vadd.f32 1.0, %v945_v20  ;;  %v390_v26 = vpop.f32.mrf.mxu0 }
 0x102   : > { %v574_v25 = vadd.f32 1.0, %v947_v23  ;;  %952 = vtanh.f32 %v511_v21  ;;  %v455_v27 = vpop.f32.mrf.mxu1  ;;  %v949_v28 = vpop.eup %948  ;;  %v497_v30 = vmul.f32 0.5, %v390_v26 }
 0x103   : > { %v605_v29 = vmul.f32 0.5, %v573_v24  ;;  %954 = vtanh.f32 %v512_v22  ;;  %v498_v31 = vmul.f32 0.5, %v455_v27  ;;  %v951_v32 = vpop.eup %950  ;;  %v559_v34 = vadd.f32 1.0, %v949_v28 }
 0x104   : > { %v606_v33 = vmul.f32 0.5, %v574_v25  ;;  %v560_v35 = vadd.f32 1.0, %v951_v32  ;;  %956 = vtanh.f32 %v497_v30 }
 0x105   : > { %637 = vst [vmem:[%s1341_s20 + $0xc0] sm:$0xff] %v605_v29  ;;  %v591_v36 = vmul.f32 0.5, %v559_v34  ;;  %958 = vtanh.f32 %v498_v31 }
 0x106   : > { %638 = vst [vmem:[%s1341_s20 + $0xc8] sm:$0xff] %v606_v33  ;;  %v592_v37 = vmul.f32 0.5, %v560_v35 }
 0x107   : > { %v414_v38 = vpop.f32.mrf.mxu2  ;;  %623 = vst [vmem:[%s1341_s20 + $0x50] sm:$0xff] %v591_v36 }
 0x108   : > { %v479_v39 = vpop.f32.mrf.mxu3  ;;  %v953_v40 = vpop.eup %952  ;;  %v513_v41 = vmul.f32 0.5, %v414_v38  ;;  %624 = vst [vmem:[%s1341_s20 + $0x58] sm:$0xff] %v592_v37 }
 0x109   : > { %v514_v42 = vmul.f32 0.5, %v479_v39  ;;  %v955_v43 = vpop.eup %954  ;;  %v575_v44 = vadd.f32 1.0, %v953_v40  ;;  %v393_v46 = vpop.f32.mrf.mxu0 }
 0x10a   : > { %v576_v45 = vadd.f32 1.0, %v955_v43  ;;  %960 = vtanh.f32 %v513_v41  ;;  %v458_v47 = vpop.f32.mrf.mxu1  ;;  %v957_v48 = vpop.eup %956  ;;  %v499_v50 = vmul.f32 0.5, %v393_v46 }
 0x10b   : > { %v607_v49 = vmul.f32 0.5, %v575_v44  ;;  %962 = vtanh.f32 %v514_v42  ;;  %v500_v51 = vmul.f32 0.5, %v458_v47  ;;  %v959_v52 = vpop.eup %958  ;;  %v561_v54 = vadd.f32 1.0, %v957_v48 }
 0x10c   : > { %v608_v53 = vmul.f32 0.5, %v576_v45  ;;  %v562_v55 = vadd.f32 1.0, %v959_v52  ;;  %964 = vtanh.f32 %v499_v50 }
 0x10d   : > { %639 = vst [vmem:[%s1341_s20 + $0xd0] sm:$0xff] %v607_v49  ;;  %v593_v56 = vmul.f32 0.5, %v561_v54  ;;  %966 = vtanh.f32 %v500_v51 }
 0x10e   : > { %640 = vst [vmem:[%s1341_s20 + $0xd8] sm:$0xff] %v608_v53  ;;  %v594_v57 = vmul.f32 0.5, %v562_v55 }
 0x10f   : > { %v417_v58 = vpop.f32.mrf.mxu2  ;;  %625 = vst [vmem:[%s1341_s20 + $0x60] sm:$0xff] %v593_v56 }
 0x110   : > { %v482_v59 = vpop.f32.mrf.mxu3  ;;  %v961_v60 = vpop.eup %960  ;;  %v515_v61 = vmul.f32 0.5, %v417_v58  ;;  %626 = vst [vmem:[%s1341_s20 + $0x68] sm:$0xff] %v594_v57 }
 0x111   : > { %v516_v62 = vmul.f32 0.5, %v482_v59  ;;  %v963_v63 = vpop.eup %962  ;;  %v577_v0 = vadd.f32 1.0, %v961_v60 }
 0x112   : > { %v578_v1 = vadd.f32 1.0, %v963_v63  ;;  %968 = vtanh.f32 %v515_v61  ;;  %v965_v2 = vpop.eup %964 }
 0x113   : > { %v609_v3 = vmul.f32 0.5, %v577_v0  ;;  %970 = vtanh.f32 %v516_v62  ;;  %v967_v4 = vpop.eup %966  ;;  %v563_v6 = vadd.f32 1.0, %v965_v2 }
 0x114   : > { %v610_v5 = vmul.f32 0.5, %v578_v1  ;;  %v564_v7 = vadd.f32 1.0, %v967_v4 }
 0x115   : > { %641 = vst [vmem:[%s1341_s20 + $0xe0] sm:$0xff] %v609_v3  ;;  %v595_v8 = vmul.f32 0.5, %v563_v6 }
 0x116   : > { %642 = vst [vmem:[%s1341_s20 + $0xe8] sm:$0xff] %v610_v5  ;;  %v596_v9 = vmul.f32 0.5, %v564_v7 }
 0x117   : > { %627 = vst [vmem:[%s1341_s20 + $0x70] sm:$0xff] %v595_v8 }
 0x118   : > { %v969_v10 = vpop.eup %968  ;;  %628 = vst [vmem:[%s1341_s20 + $0x78] sm:$0xff] %v596_v9 }
 0x119   : > { %v971_v11 = vpop.eup %970  ;;  %v579_v12 = vadd.f32 1.0, %v969_v10 }
 0x11a   : > { %v580_v13 = vadd.f32 1.0, %v971_v11 }
 0x11b   : > { %v611_v14 = vmul.f32 0.5, %v579_v12 }
 0x11c   : > { %v612_v15 = vmul.f32 0.5, %v580_v13 }
 0x11d   : > { %643 = vst [vmem:[%s1341_s20 + $0xf0] sm:$0xff] %v611_v14 }
 0x11e   : > { %644 = vst [vmem:[%s1341_s20 + $0xf8] sm:$0xff] %v612_v15 }
 0x11f   : > { %999 = shalt.err (!%p996_p5)
}
 0x120   : > { %s1052_s15 = smov 256   ;;  %s1053_s7 = smov 16  }
 0x121   : > { %851 = dma.vmem_to_hbm [thread:$0]  (%p1109_p4), %s662_s12, 4096, %s664_s27, %s646_s28, %s1052_s15, %s1052_s15, %s1053_s7  }
 0x122 PF: > { %p857_p6 = scmp.ge.s32.totalorder %s1050_s14, 2  ;;  %s678_s16 = sand.u32 1, %s1030_s9  }
 0x123   : > { %s679_s18 = scalar_lea.sflag [#allocation3], %s678_s16 }
 0x124   : > { %p854_p7 = pnand %p857_p6, %p1116_p8 }
 0x126   : > { %p855_p9 = pneg %p854_p7 }
 0x128   : > { %1025 = dma.done.wait (%p855_p9), %s679_s18, 4096  }
 0x129   : > { %1027 = vsyncadd (%p855_p9), %s679_s18, 4294963200  ;;  %s15_s14 = sadd.s32 1, %s1050_s14   ;;  %s1419_s9 = smov %s1034_s10 }
 0x12a   : > { %p12_p10 = scmp.ge.s32.totalorder %s15_s14, 4   ;;  %s1420_s10 = smov %s1038_s11 }
 0x12b   : > { %s1421_s11 = smov %s1122_s22  ;;  %s1422_s12 = smov %s1046_s13 }
 0x12c   : > { %s1423_s13 = smov %s1425_s17  ;;  %14 = sbr.rel (!%p12_p10) target bundleno = 4 (0x4), region = 64 }
 0x131   :  { %685 = vsyncpa [#allocation3], 1 }
 0x132   :  { %687 = vsyncpa [#allocation3 + $0x1], 1 }

</bundles_post_ra>
